<compile_context>
chip_gen: v7x
topology: tpu7x:2x2x1
jax: 0.10.0
libtpu: 0.0.40
codegen_flags: <defaults>
</compile_context>

<pallas_src>
import functools

import jax
import jax.numpy as jnp
from jax import lax
from jax.experimental import pallas as pl
from jax.experimental.pallas import tpu as pltpu


_MIN_GRID_STEPS = 8            # enough steps for DMA pipelining + megacore
_MIN_STEP_HBM_BYTES = 1 << 20  # don't shrink blocks below ~1 MiB/step of traffic


def _cdiv(a, b):
    return -(-a // b)


def _vmem_capacity_bytes():
    """Physical VMEM of this generation (128 MiB v5e/v6e, 64 MiB/TC v7x)."""
    try:
        return int(pltpu.get_tpu_info().vmem_capacity_bytes)
    except Exception:
        return 64 << 20  # conservative fallback (v7x per-core size)


def _choose_chunk_rows(l_out, vmem_bytes_per_row, hbm_bytes_per_row,
                       outer_steps, vmem_budget_bytes):
    """Per-output row chunk G: largest multiple of 8 (or l_out itself) whose
    double-buffered VMEM footprint fits the budget.  G need NOT divide l_out:
    the grid uses cdiv and edge blocks are padded/masked.  G is shrunk only
    if that buys enough grid steps for pipelining without making each step's
    HBM traffic trivially small."""
    g = (vmem_budget_bytes // max(vmem_bytes_per_row, 1)) // 8 * 8
    g = min(max(g, 8), l_out)

    def n_steps(gg):
        return outer_steps * _cdiv(l_out, gg)

    while (n_steps(g) < _MIN_GRID_STEPS and g > 8
           and (g // 2) * hbm_bytes_per_row >= _MIN_STEP_HBM_BYTES):
        g = max(8, (g // 2) // 8 * 8)
    return g


def _dma_split_kernel(x_ref, *out_refs):
    """DMA-split path: x_ref already holds exactly split i's rows (g, Cw)."""
    i = pl.program_id(2)
    for j in range(len(out_refs)):
        @pl.when(i == j)
        def _copy(out_ref=out_refs[j]):
            out_ref[...] = x_ref[...]


def _strided_split_kernel(x_ref, *out_refs, step_size):
    """Fallback: x_ref is (g*step_size, C); sublane-strided extraction."""
    g = out_refs[0].shape[0]
    for i in range(step_size):
        out_refs[i][...] = x_ref[pl.ds(i, g, stride=step_size), :]


def splitting(x, step_size, *, vmem_budget_bytes=None):
    """Pallas equivalent of Splitting(step_size)(x) for x of shape [B, L, C]."""
    B, L, C = x.shape
    if step_size == 1:
        return [x]                       # no-op split: skip the HBM round trip
    if L % step_size != 0:
        # TODO(synk): ragged split lengths (L % step_size != 0) not supported.
        raise NotImplementedError("this kernel assumes L divisible by step_size")
    l_out = L // step_size

    orig_dtype = x.dtype
    itemsize = jnp.dtype(orig_dtype).itemsize

    # Pack sub-32-bit dtypes into 32-bit lane containers wrapper-side (free
    # bitcasts), so the kernel never does strided reads on packed sublanes.
    pack = itemsize < 4 and (C * itemsize) % 4 == 0
    if pack:
        r = 4 // itemsize
        xw = lax.bitcast_convert_type(x.reshape(B, L, C // r, r), jnp.int32)
    else:
        # TODO(synk): sub-32-bit dtypes whose channel byte-width is not a
        # multiple of 4 take the strided path in their native dtype (untested).
        xw = x
    Cw = xw.shape[-1]
    witemsize = jnp.dtype(xw.dtype).itemsize

    capacity = _vmem_capacity_bytes()
    budget = vmem_budget_bytes if vmem_budget_bytes is not None else capacity // 4

    use_dma_split = (Cw % 128 == 0)

    if use_dma_split:
        # De-interleave in the input DMA: view x as [B, l_out, step*Cw]; grid
        # axis i selects the Cw-wide column strip of split i.  Kernel is a
        # dense copy; each output block is written once (at i == j) and DMA'd
        # back when the l index advances (block-revisit pattern).
        x_in = xw.reshape(B, l_out, step_size * Cw)
        vmem_per_row = 2 * (step_size + 1) * Cw * witemsize   # dbl-buffered windows
        hbm_per_row = 2 * Cw * witemsize                      # per grid step
        g = _choose_chunk_rows(l_out, vmem_per_row, hbm_per_row,
                               B * step_size, budget)
        grid = (B, _cdiv(l_out, g), step_size)
        in_specs = [pl.BlockSpec((None, g, Cw), lambda b, l, i: (b, l, i))]
        out_specs = tuple(pl.BlockSpec((None, g, Cw), lambda b, l, i: (b, l, 0))
                          for _ in range(step_size))
        kernel = _dma_split_kernel
        dims = ("parallel", "parallel", "arbitrary")
    else:
        # Fallback: contiguous input block of g*step rows, sublane-strided
        # extraction per split.  Last dim equals the full channel dim so the
        # BlockSpec is legal for any C (masked stores when C is not lane-dense).
        x_in = xw
        vmem_per_row = 4 * step_size * Cw * witemsize
        hbm_per_row = 2 * step_size * Cw * witemsize
        g = _choose_chunk_rows(l_out, vmem_per_row, hbm_per_row, B, budget)
        grid = (B, _cdiv(l_out, g))
        in_specs = [pl.BlockSpec((None, g * step_size, Cw), lambda b, l: (b, l, 0))]
        out_specs = tuple(pl.BlockSpec((None, g, Cw), lambda b, l: (b, l, 0))
                          for _ in range(step_size))
        kernel = functools.partial(_strided_split_kernel, step_size=step_size)
        dims = ("parallel", "parallel")

    footprint = vmem_per_row * g
    vmem_limit = int(footprint * 1.5) + (2 << 20)
    vmem_limit = min(vmem_limit, int(capacity * 0.7))   # headroom on v7x's 64 MiB
    vmem_limit = max(vmem_limit, 4 << 20)

    out_shapes = tuple(jax.ShapeDtypeStruct((B, l_out, Cw), xw.dtype)
                       for _ in range(step_size))

    fn = pl.pallas_call(
        kernel,
        out_shape=out_shapes,
        grid=grid,
        in_specs=in_specs,
        out_specs=out_specs,
        compiler_params=pltpu.CompilerParams(
            dimension_semantics=dims,
            vmem_limit_bytes=vmem_limit,
        ),
        cost_estimate=pl.CostEstimate(
            flops=0, transcendentals=0,
            bytes_accessed=2 * B * L * Cw * witemsize),
    )
    outs = list(fn(x_in))

    if pack:
        outs = [lax.bitcast_convert_type(o, orig_dtype).reshape(B, l_out, C)
                for o in outs]
    return outs


def _check(x, step_size, **kw):
    outs = jax.block_until_ready(splitting(x, step_size, **kw))
    for i, o in enumerate(outs):
        ref = x[:, i::step_size, :]
        assert o.shape == ref.shape and o.dtype == ref.dtype, (o.shape, ref.shape)
        assert jnp.array_equal(o, ref), f"mismatch in split {i}"


if __name__ == "__main__":
    key = jax.random.PRNGKey(0)
    k1, k2, k3, k4 = jax.random.split(key, 4)

    # 1) lane-dense channels -> DMA-split path (main config).
    _check(jax.random.normal(k1, (2, 64, 128), dtype=jnp.float32), 4)
    # 2) awkward channel count (AnomalyTransformer-like enc_in) -> strided path.
    _check(jax.random.normal(k2, (2, 64, 32), dtype=jnp.float32), 4)
    # 3) bf16 -> packed into int32 containers wrapper-side.
    _check(jax.random.normal(k3, (2, 64, 128), dtype=jnp.bfloat16), 2)
    # 4) forced-small VMEM budget + l_out not divisible by the chunk:
    #    exercises cdiv grid + masked edge blocks on both paths.
    _check(jax.random.normal(k4, (1, 4100, 128), dtype=jnp.float32), 2,
           vmem_budget_bytes=96 * 1024)
    _check(jax.random.normal(k4, (1, 4100, 32), dtype=jnp.float32), 2,
           vmem_budget_bytes=96 * 1024)
    # 5) step_size == 1 short-circuit.
    _check(jax.random.normal(k1, (2, 64, 128), dtype=jnp.float32), 1)

    print("KERNEL_OK")
</pallas_src>

<mosaic_0001>
module attributes {stable_mosaic.version = 11 : i64} {
  func.func @_dma_split_kernel(%arg0: i32, %arg1: i32, %arg2: i32, %arg3: memref<1x16x128xf32, #tpu.memory_space<vmem>>, %arg4: memref<1x16x128xf32, #tpu.memory_space<vmem>>, %arg5: memref<1x16x128xf32, #tpu.memory_space<vmem>>, %arg6: memref<1x16x128xf32, #tpu.memory_space<vmem>>, %arg7: memref<1x16x128xf32, #tpu.memory_space<vmem>>) attributes {dimension_semantics = [#tpu.dimension_semantics<parallel>, #tpu.dimension_semantics<parallel>, #tpu.dimension_semantics<arbitrary>], iteration_bounds = array<i64: 2, 1, 4>, scalar_prefetch = 0 : i64, scratch_operands = 0 : i64, tpu.core_type = #tpu.core_type<tc>, window_params = [{transform_indices = @transform_0, window_bounds = array<i64: 1, 16, 128>}, {transform_indices = @transform_1, window_bounds = array<i64: 1, 16, 128>}, {transform_indices = @transform_2, window_bounds = array<i64: 1, 16, 128>}, {transform_indices = @transform_3, window_bounds = array<i64: 1, 16, 128>}, {transform_indices = @transform_4, window_bounds = array<i64: 1, 16, 128>}]} {
    %c0_i32 = arith.constant 0 : i32
    %0 = arith.cmpi eq, %arg2, %c0_i32 : i32
    %1 = arith.extui %0 : i1 to i32
    %c0_i32_0 = arith.constant 0 : i32
    %2 = arith.cmpi ne, %1, %c0_i32_0 : i32
    scf.if %2 {
      %c0 = arith.constant 0 : index
      %c0_4 = arith.constant 0 : index
      %c0_5 = arith.constant 0 : index
      %12 = vector.load %arg3[%c0, %c0_4, %c0_5] : memref<1x16x128xf32, #tpu.memory_space<vmem>>, vector<1x16x128xf32>
      %13 = vector.shape_cast %12 : vector<1x16x128xf32> to vector<16x128xf32>
      %c0_6 = arith.constant 0 : index
      %c0_7 = arith.constant 0 : index
      %c0_8 = arith.constant 0 : index
      %14 = vector.load %arg4[%c0_6, %c0_7, %c0_8] : memref<1x16x128xf32, #tpu.memory_space<vmem>>, vector<1x16x128xf32>
      %15 = vector.shape_cast %14 : vector<1x16x128xf32> to vector<16x128xf32>
      %16 = vector.shape_cast %13 : vector<16x128xf32> to vector<1x16x128xf32>
      tpu.vector_store %arg4[%c0_6, %c0_7, %c0_8], %16 {strides = array<i32>} : memref<1x16x128xf32, #tpu.memory_space<vmem>>, vector<1x16x128xf32>,
    } else {
    }
    %c1_i32 = arith.constant 1 : i32
    %3 = arith.cmpi eq, %arg2, %c1_i32 : i32
    %4 = arith.extui %3 : i1 to i32
    %c0_i32_1 = arith.constant 0 : i32
    %5 = arith.cmpi ne, %4, %c0_i32_1 : i32
    scf.if %5 {
      %c0 = arith.constant 0 : index
      %c0_4 = arith.constant 0 : index
      %c0_5 = arith.constant 0 : index
      %12 = vector.load %arg3[%c0, %c0_4, %c0_5] : memref<1x16x128xf32, #tpu.memory_space<vmem>>, vector<1x16x128xf32>
      %13 = vector.shape_cast %12 : vector<1x16x128xf32> to vector<16x128xf32>
      %c0_6 = arith.constant 0 : index
      %c0_7 = arith.constant 0 : index
      %c0_8 = arith.constant 0 : index
      %14 = vector.load %arg5[%c0_6, %c0_7, %c0_8] : memref<1x16x128xf32, #tpu.memory_space<vmem>>, vector<1x16x128xf32>
      %15 = vector.shape_cast %14 : vector<1x16x128xf32> to vector<16x128xf32>
      %16 = vector.shape_cast %13 : vector<16x128xf32> to vector<1x16x128xf32>
      tpu.vector_store %arg5[%c0_6, %c0_7, %c0_8], %16 {strides = array<i32>} : memref<1x16x128xf32, #tpu.memory_space<vmem>>, vector<1x16x128xf32>,
    } else {
    }
    %c2_i32 = arith.constant 2 : i32
    %6 = arith.cmpi eq, %arg2, %c2_i32 : i32
    %7 = arith.extui %6 : i1 to i32
    %c0_i32_2 = arith.constant 0 : i32
    %8 = arith.cmpi ne, %7, %c0_i32_2 : i32
    scf.if %8 {
      %c0 = arith.constant 0 : index
      %c0_4 = arith.constant 0 : index
      %c0_5 = arith.constant 0 : index
      %12 = vector.load %arg3[%c0, %c0_4, %c0_5] : memref<1x16x128xf32, #tpu.memory_space<vmem>>, vector<1x16x128xf32>
      %13 = vector.shape_cast %12 : vector<1x16x128xf32> to vector<16x128xf32>
      %c0_6 = arith.constant 0 : index
      %c0_7 = arith.constant 0 : index
      %c0_8 = arith.constant 0 : index
      %14 = vector.load %arg6[%c0_6, %c0_7, %c0_8] : memref<1x16x128xf32, #tpu.memory_space<vmem>>, vector<1x16x128xf32>
      %15 = vector.shape_cast %14 : vector<1x16x128xf32> to vector<16x128xf32>
      %16 = vector.shape_cast %13 : vector<16x128xf32> to vector<1x16x128xf32>
      tpu.vector_store %arg6[%c0_6, %c0_7, %c0_8], %16 {strides = array<i32>} : memref<1x16x128xf32, #tpu.memory_space<vmem>>, vector<1x16x128xf32>,
    } else {
    }
    %c3_i32 = arith.constant 3 : i32
    %9 = arith.cmpi eq, %arg2, %c3_i32 : i32
    %10 = arith.extui %9 : i1 to i32
    %c0_i32_3 = arith.constant 0 : i32
    %11 = arith.cmpi ne, %10, %c0_i32_3 : i32
    scf.if %11 {
      %c0 = arith.constant 0 : index
      %c0_4 = arith.constant 0 : index
      %c0_5 = arith.constant 0 : index
      %12 = vector.load %arg3[%c0, %c0_4, %c0_5] : memref<1x16x128xf32, #tpu.memory_space<vmem>>, vector<1x16x128xf32>
      %13 = vector.shape_cast %12 : vector<1x16x128xf32> to vector<16x128xf32>
      %c0_6 = arith.constant 0 : index
      %c0_7 = arith.constant 0 : index
      %c0_8 = arith.constant 0 : index
      %14 = vector.load %arg7[%c0_6, %c0_7, %c0_8] : memref<1x16x128xf32, #tpu.memory_space<vmem>>, vector<1x16x128xf32>
      %15 = vector.shape_cast %14 : vector<1x16x128xf32> to vector<16x128xf32>
      %16 = vector.shape_cast %13 : vector<16x128xf32> to vector<1x16x128xf32>
      tpu.vector_store %arg7[%c0_6, %c0_7, %c0_8], %16 {strides = array<i32>} : memref<1x16x128xf32, #tpu.memory_space<vmem>>, vector<1x16x128xf32>,
    } else {
    }
    return
  }
  func.func @transform_0(%arg0: i32, %arg1: i32, %arg2: i32) -> (i32, i32, i32) {
    %c0_i32 = arith.constant 0 : i32
    return %arg0, %arg1, %arg2 : i32, i32, i32
  }
  func.func @transform_1(%arg0: i32, %arg1: i32, %arg2: i32) -> (i32, i32, i32) {
    %c0_i32 = arith.constant 0 : i32
    %c0_i32_0 = arith.constant 0 : i32
    return %arg0, %arg1, %c0_i32 : i32, i32, i32
  }
  func.func @transform_2(%arg0: i32, %arg1: i32, %arg2: i32) -> (i32, i32, i32) {
    %c0_i32 = arith.constant 0 : i32
    %c0_i32_0 = arith.constant 0 : i32
    return %arg0, %arg1, %c0_i32 : i32, i32, i32
  }
  func.func @transform_3(%arg0: i32, %arg1: i32, %arg2: i32) -> (i32, i32, i32) {
    %c0_i32 = arith.constant 0 : i32
    %c0_i32_0 = arith.constant 0 : i32
    return %arg0, %arg1, %c0_i32 : i32, i32, i32
  }
  func.func @transform_4(%arg0: i32, %arg1: i32, %arg2: i32) -> (i32, i32, i32) {
    %c0_i32 = arith.constant 0 : i32
    %c0_i32_0 = arith.constant 0 : i32
    return %arg0, %arg1, %c0_i32 : i32, i32, i32
  }
}

</mosaic_0001>

<bundles_post_ra>
// kernel: tpu_custom_call.1
= control target key start
LH: loop header
LB: loop body
LE: loop exit
PB: predicated region body
PF: predicated region fallthrough
CT: control target
= control target key end

     0   :  { %s1412_s0 = inlined_call_operand.hbm [shape: f32[2,16,512], index: 0, kind: input, shape index: {}]   ;;  %s1413_s1 = inlined_call_operand.hbm [shape: f32[2,16,128], index: 1, kind: output, shape index: {0}]   ;;  %s1414_s2 = inlined_call_operand.hbm [shape: f32[2,16,128], index: 2, kind: output, shape index: {1}]   ;;  %s1415_s3 = inlined_call_operand.hbm [shape: f32[2,16,128], index: 3, kind: output, shape index: {2}]   ;;  %s1416_s4 = inlined_call_operand.hbm [shape: f32[2,16,128], index: 4, kind: output, shape index: {3}]  }
   0x1   :  { %1423 = sst [smem:[#allocation19_spill]] %s1412_s0 }
   0x2   :  { %1424 = sst [smem:[#allocation20_spill]] %s1414_s2 }
   0x3   :  { %1425 = sst [smem:[#allocation21_spill]] %s1416_s4 }
   0x4   :  { %10 = vsyncpa [#allocation3], 0 }
   0x5   :  { %12 = vsyncpa [#allocation3 + $0x1], 0 }
   0x6   :  { %13 = vsyncpa [#allocation4], 0 }
   0x7   :  { %15 = vsyncpa [#allocation4 + $0x1], 0 }
   0x8   :  { %16 = vsyncpa [#allocation7], 0 }
   0x9   :  { %18 = vsyncpa [#allocation7 + $0x1], 0 }
   0xa   :  { %19 = vsyncpa [#allocation10], 0 }
   0xb   :  { %21 = vsyncpa [#allocation10 + $0x1], 0  ;;  %s1035_s15 = smov 0   ;;  %s1037_s16 = smov 0  }
   0xc   :  { %s1039_s17 = smov 0   ;;  %s1041_s18 = smov 0  }
   0xd   :  { %s1043_s19 = smov 0   ;;  %s1045_s20 = smov 0  }
   0xe   :  { %s1047_s21 = smov 0   ;;  %s1049_s22 = smov 0  }
   0xf   :  { %s1051_s23 = smov 0   ;;  %s1053_s24 = smov 0  }
  0x10   :  { %s1055_s25 = smov 0  }
  0x11 LB: > { %1426 = sst [smem:[#allocation15_spill]] %s994_s24  ;;  %s1089_s26 = sadd.s32 4294967295, %s998_s25   ;;  %s998_s25 = sphi %s1055_s25, %s27_s25   ;;  %s994_s24 = sphi %s1053_s24, %s1445_s24   ;;  %s990_s23 = sphi %s1051_s23, %s1453_s23   ;;  %s986_s22 = sphi %s1049_s22, %s1443_s22   ;;  %s982_s21 = sphi %s1047_s21, %s1452_s21   ;;  %s978_s20 = sphi %s1045_s20, %s1451_s20   ;;  %s974_s19 = sphi %s1043_s19, %s1450_s19   ;;  %s970_s18 = sphi %s1041_s18, %s1449_s18   ;;  %s966_s17 = sphi %s1039_s17, %s1448_s17   ;;  %s962_s16 = sphi %s1037_s16, %s1447_s16   ;;  %s958_s15 = sphi %s1035_s15, %s1446_s15  }
  0x12   : > { %s1420_s27 = sadd.s32 4294967294, %s998_s25   ;;  %s39_s28 = sadd.s32 1, %s990_s23 }
  0x13   : > { %s46_s29 = sadd.s32 1, %s994_s24  ;;  %p40_p0 = scmp.ge.s32.totalorder %s39_s28, 4 }
  0x14   : > { %s57_s30 = sadd.s32 1, %s978_s20  ;;  %p64_p1 = scmp.ne.s32.totalorder %s978_s20, %s974_s19 }
  0x15   : > { %p65_p2 = scmp.eq.s32.totalorder %s998_s25, 0  ;;  %s1455_s28 = smov (%p40_p0, %s39_s28), 0 }
  0x16   : > { %1427 = sst [smem:[#allocation16_spill]] %s1455_s28  ;;  %s1457_s29 = smov (!%p40_p0, %s46_s29), %s994_s24 }
  0x17   : > { %s53_s5 = ssub.s32 %s990_s23, %s1455_s28  ;;  %p1103_p3 = por %p65_p2, %p64_p1 }
  0x18   : > { %p48_p4 = scmp.ge.s32.totalorder %s1457_s29, 2  ;;  %p70_p5 = scmp.ne.s32.totalorder %s974_s19, %s970_s18 }
  0x19   : > { %p71_p6 = scmp.eq.s32.totalorder %s1089_s26, 0  ;;  %s85_s7 = sadd.s32 1, %s966_s17 }
  0x1a   : > { %s1459_s29 = smov (%p48_p4, %s1457_s29), 0  ;;  %p95_p8 = scmp.ne.s32.totalorder %s966_s17, %s962_s16 }
  0x1b   : > { %1429 = sst [smem:[#allocation17_spill]] %s1459_s29  ;;  %p1112_p7 = por %p71_p6, %p70_p5 }
  0x1c   : > { %s50_s9 = ssub.s32 %s994_s24, %s1459_s29  ;;  %p96_p9 = scmp.eq.s32.totalorder %s1089_s26, 7 }
  0x1d   : > { %s54_s10 = sor.u32 %s53_s5, %s50_s9  ;;  %p83_p10 = scmp.eq.s32.totalorder %s50_s9, 0 }
  0x1e   : > { %p55_p11 = scmp.eq.s32.totalorder %s54_s10, 0  ;;  %p1121_p12 = por %p96_p9, %p95_p8 }
  0x1f   : > { %s1126_s12 = scalar_select %p83_p10, %s966_s17, %s85_s7  }
  0x20   : > { %s1431_s11 = scalar_select %p1121_p12, 1, 0 }
  0x21   : > { %s1129_s13 = scalar_select %p55_p11, %s978_s20, %s57_s30  }
  0x22   : > { %p101_p13 = scmp.ne.s32.totalorder %s962_s16, %s958_s15  ;;  %p102_p0 = scmp.eq.s32.totalorder %s1420_s27, 7 }
  0x23   : > { %1432 = sst [smem:[#allocation18_spill]] %s1129_s13  ;;  %p659_p1 = scmp.lt.s32.totalorder %s998_s25, 8 }
  0x24   : > { %p1136_p2 = por %p102_p0, %p101_p13  ;;  %s206_s18 = sand.u32 1, %s978_s20  }
  0x25   : > { %s601_s5 = sshll.u32 %s206_s18, 4  ;;  %s602_s9 = sshll.u32 %s994_s24, 3 }
  0x26   : > { %s1433_s14 = scalar_select %p1136_p2, 1, 0 }
  0x27   : > { %s218_s10 = sadd.s32 %s990_s23, %s602_s9  ;;  %s210_s29 = scalar_lea.vmem [#allocation2], %s601_s5 }
  0x28   : > { %s221_s28 = sshll.u32 %s210_s29, 4  ;;  %s603_s4 = sshll.u32 %s218_s10, 7  ;;  %s1143_s28 = int_to_ptr.vmem [resolvable:$true] %s221_s28 }
  0x29   : > { %s1434_s0 = sld [smem:[#allocation19_spill]]  ;;  %p1152_p4 = pnand %p659_p1, %p1103_p3 }
  0x2a   : > { %s1156_s29 = scalar_lea.sflag [#allocation3], %s206_s18 }
  0x2b   : > { %p756_p6 = pneg %p1152_p4 }
  0x2f   : > { %s1148_s13 = scalar_lea.hbm %s1434_s0, %s603_s4  ;;  %s759_s9 = scalar_lea.hbm %s1434_s0, 2048 }
  0x30   : > { %s754_s5 = scalar_lea.hbm %s1148_s13, 256  ;;  %p760_p3 = scmp.lt.u32.totalorder %s1148_s13, %s1434_s0 }
  0x31   : > { %p755_p5 = scmp.ne.s32.totalorder %s1148_s13, %s754_s5  ;;  %p761_p10 = scmp.lt.u32.totalorder %s759_s9, %s754_s5 }
  0x32   : > { %p763_p13 = scmp.lt.u32.totalorder %s754_s5, %s1148_s13 }
  0x33   : > { %p757_p8 = pnand %p756_p6, %p755_p5  ;;  %p762_p11 = por %p761_p10, %p760_p3 }
  0x35   : > { %p758_p9 = pneg %p757_p8  ;;  %p764_p0 = por %p763_p13, %p762_p11 }
  0x37   : > { %p765_p1 = pnand %p764_p0, %p758_p9 }
  0x39   : > { %768 = shalt.err (!%p765_p1)
}
  0x3a   : > { %s769_s18 = scalar_lea.vmem %s1143_s28, 256  ;;  %s1000_s30 = smov [#allocation2]  }
  0x3b   : > { %p770_p5 = scmp.ne.s32.totalorder %s1143_s28, %s769_s18  ;;  %s774_s4 = sshll.u32 %s1000_s30, 4  ;;  %s775_s4 = int_to_ptr.vmem [resolvable:$false] %s774_s4 }
  0x3c   : > { %s776_s6 = scalar_lea.vmem %s775_s4, 512  ;;  %p777_p12 = scmp.lt.s32.totalorder %s1143_s28, %s775_s4 }
  0x3d   : > { %p772_p8 = pnand %p770_p5, %p756_p6  ;;  %p778_p3 = scmp.lt.s32.totalorder %s776_s6, %s769_s18 }
  0x3f   : > { %p773_p2 = pneg %p772_p8  ;;  %p779_p10 = por %p778_p3, %p777_p12 }
  0x41   : > { %p780_p11 = pnand %p779_p10, %p773_p2 }
  0x43   : > { %783 = shalt.err (!%p780_p11)
}
  0x44   : > { %s1001_s5 = smov 512   ;;  %s1002_s9 = smov 128  }
  0x45   : > { %s1003_s10 = smov 8   ;;  %p604_p6 = scmp.ge.s32.totalorder %s998_s25, 1 }
  0x46   : > { %645 = dma.hbm_to_vmem [thread:$0]  (!%p1152_p4), %s1148_s13, 256, %s1143_s28, %s1156_s29, %s1001_s5, %s1002_s9, %s1003_s10  }
  0x47   : > { %p229_p9 = scmp.lt.s32.totalorder %s998_s25, 9 }
  0x49   : > { %p230_p13 = pnand %p604_p6, %p229_p9 }
  0x4a   : > { %s235_s7 = sand.u32 (!%p230_p13), 1, %s974_s19  }
  0x4b   : > { %233 = sbr.rel (%p230_p13) target bundleno = 220 (0xdc), region = 24  ;;  %s605_s18 = sshll.u32 (!%p230_p13), %s235_s7, 4 }
  0x4c   : > { %s236_s30 = scalar_lea.sflag (!%p230_p13), [#allocation3], %s235_s7  ;;  %s1187_s4 = scalar_lea.vmem (!%p230_p13), [#allocation2], %s605_s18 }
  0x52   : > { %941 = dma.done.wait (%p1112_p7), %s236_s30, 256  }
  0x53   : > { %943 = vsyncadd (%p1112_p7), %s236_s30, 4294967040  ;;  %s1194_s6 = sand.u32 1, %s962_s16   ;;  %p610_p12 = scmp.ne.s32.totalorder %s982_s21, 0 }
  0x54   : > { %s606_s27 = sshll.u32 %s1194_s6, 4  ;;  %v288_v0 = vld [vmem:[%s1187_s4] sm:$0xff] (!%p610_p12)  ;;  %v289_v1 = vld [vmem:[%s1187_s4 + $0x8] sm:$0xff] (!%p610_p12) }
  0x55   : > { %s1197_s28 = scalar_lea.vmem [#allocation5], %s606_s27  ;;  %s1199_s13 = scalar_lea.vmem [#allocation6], %s606_s27 }
  0x56   : > { %s1201_s29 = scalar_lea.vmem [#allocation8], %s606_s27  ;;  %s1203_s5 = scalar_lea.vmem [#allocation9], %s606_s27  ;;  %290 = vst [vmem:[%s1197_s28] sm:$0xff] (!%p610_p12), %v288_v0  ;;  %291 = vst [vmem:[%s1197_s28 + $0x8] sm:$0xff] (!%p610_p12), %v289_v1 }
  0x57   : > { %287 = sbr.rel (%p610_p12) target bundleno = 94 (0x5e), region = 32 }
  0x5e PF: > { %p611_p7 = scmp.ne.s32.totalorder %s982_s21, 1 }
  0x5f   : > { %v296_v2 = vld [vmem:[%s1187_s4] sm:$0xff] (!%p611_p7)  ;;  %v297_v3 = vld [vmem:[%s1187_s4 + $0x8] sm:$0xff] (!%p611_p7) }
  0x60   : > { %295 = sbr.rel (%p611_p7) target bundleno = 103 (0x67), region = 36  ;;  %298 = vst [vmem:[%s1199_s13] sm:$0xff] (!%p611_p7), %v296_v2  ;;  %299 = vst [vmem:[%s1199_s13 + $0x8] sm:$0xff] (!%p611_p7), %v297_v3 }
  0x67 PF: > { %p612_p2 = scmp.ne.s32.totalorder %s982_s21, 2 }
  0x68   : > { %v304_v4 = vld [vmem:[%s1187_s4] sm:$0xff] (!%p612_p2)  ;;  %v305_v5 = vld [vmem:[%s1187_s4 + $0x8] sm:$0xff] (!%p612_p2) }
  0x69   : > { %303 = sbr.rel (%p612_p2) target bundleno = 112 (0x70), region = 40  ;;  %306 = vst [vmem:[%s1201_s29] sm:$0xff] (!%p612_p2), %v304_v4  ;;  %307 = vst [vmem:[%s1201_s29 + $0x8] sm:$0xff] (!%p612_p2), %v305_v5 }
  0x70 PF: > { %p613_p4 = scmp.ne.s32.totalorder %s982_s21, 3 }
  0x71   : > { %v312_v6 = vld [vmem:[%s1187_s4] sm:$0xff] (!%p613_p4)  ;;  %v313_v7 = vld [vmem:[%s1187_s4 + $0x8] sm:$0xff] (!%p613_p4) }
  0x72   : > { %311 = sbr.rel (%p613_p4) target bundleno = 121 (0x79), region = 44  ;;  %314 = vst [vmem:[%s1203_s5] sm:$0xff] (!%p613_p4), %v312_v6  ;;  %315 = vst [vmem:[%s1203_s5 + $0x8] sm:$0xff] (!%p613_p4), %v313_v7 }
  0x79 PF: > { %s321_s8 = sand.u32 1, %s1089_s26   ;;  %s1227_s9 = sshll.u32 %s986_s22, 8 }
  0x7a   : > { %s1436_s2 = sld [smem:[#allocation20_spill]]  ;;  %s365_s18 = sshll.u32 %s1199_s13, 4  ;;  %s1236_s18 = int_to_ptr.vmem [resolvable:$true] %s365_s18 }
  0x7b   : > { %s1242_s27 = scalar_lea.hbm %s1413_s1, %s1227_s9  ;;  %s1244_s22 = scalar_lea.sflag [#allocation7], %s321_s8 }
  0x7c   : > { %s784_s26 = scalar_lea.vmem %s1236_s18, 256  ;;  %p1437_p1 = scmp.ne.s32.totalorder %s1431_s11, 0 }
  0x7d   : > { %p785_p0 = scmp.ne.s32.totalorder %s1236_s18, %s784_s26  ;;  %s1004_s10 = smov [#allocation6]  }
  0x7e   : > { %s788_s21 = sshll.u32 %s1004_s10, 4  ;;  %s789_s21 = int_to_ptr.vmem [resolvable:$false] %s788_s21 }
  0x7f   : > { %p786_p5 = pnand %p785_p0, %p1437_p1  ;;  %s790_s13 = scalar_lea.vmem %s789_s21, 512 }
  0x80   : > { %s1233_s7 = scalar_lea.hbm %s1436_s2, %s1227_s9  ;;  %p791_p3 = scmp.lt.s32.totalorder %s1236_s18, %s789_s21 }
  0x81   : > { %p787_p8 = pneg %p786_p5  ;;  %p792_p10 = scmp.lt.s32.totalorder %s790_s13, %s784_s26 }
  0x83   : > { %p793_p11 = por %p792_p10, %p791_p3 }
  0x85   : > { %p794_p6 = pnand %p793_p11, %p787_p8 }
  0x87   : > { %797 = shalt.err (!%p794_p6)
}
  0x88   : > { %s798_s8 = scalar_lea.hbm %s1233_s7, 256  ;;  %s802_s10 = scalar_lea.hbm %s1436_s2, 512 }
  0x89   : > { %p799_p9 = scmp.ne.s32.totalorder %s1233_s7, %s798_s8  ;;  %p803_p7 = scmp.lt.u32.totalorder %s1233_s7, %s1436_s2 }
  0x8a   : > { %p804_p2 = scmp.lt.u32.totalorder %s802_s10, %s798_s8  ;;  %p806_p0 = scmp.lt.u32.totalorder %s798_s8, %s1233_s7 }
  0x8b   : > { %p800_p13 = pnand %p799_p9, %p1437_p1 }
  0x8c   : > { %p805_p4 = por %p804_p2, %p803_p7 }
  0x8d   : > { %p801_p12 = pneg %p800_p13 }
  0x8e   : > { %p807_p5 = por %p806_p0, %p805_p4 }
  0x90   : > { %p808_p8 = pnand %p807_p5, %p801_p12 }
  0x92   : > { %811 = shalt.err (!%p808_p8)
}
  0x93   : > { %s1005_s26 = smov 128   ;;  %s1006_s13 = smov 8  }
  0x94   : > { %635 = dma.vmem_to_hbm [thread:$0]  (%p1437_p1), %s1236_s18, 256, %s1233_s7, %s1244_s22, %s1005_s26, %s1005_s26, %s1006_s13  }
  0x95   : > { %s347_s0 = sshll.u32 %s1197_s28, 4  ;;  %s1276_s4 = scalar_lea.hbm %s1415_s3, %s1227_s9  ;;  %s1278_s0 = int_to_ptr.vmem [resolvable:$true] %s347_s0 }
  0x96   : > { %s317_s21 = scalar_lea.sflag [#allocation4], %s1194_s6  ;;  %s812_s2 = scalar_lea.vmem %s1278_s0, 256 }
  0x97   : > { %p813_p3 = scmp.ne.s32.totalorder %s1278_s0, %s812_s2  ;;  %s1007_s24 = smov [#allocation5]  }
  0x98   : > { %s816_s7 = sshll.u32 %s1007_s24, 4  ;;  %s817_s7 = int_to_ptr.vmem [resolvable:$false] %s816_s7 }
  0x99   : > { %p814_p10 = pnand %p813_p3, %p1437_p1  ;;  %s818_s28 = scalar_lea.vmem %s817_s7, 512 }
  0x9a   : > { %p819_p6 = scmp.lt.s32.totalorder %s1278_s0, %s817_s7  ;;  %p820_p9 = scmp.lt.s32.totalorder %s818_s28, %s812_s2 }
  0x9b   : > { %p815_p11 = pneg %p814_p10 }
  0x9c   : > { %p821_p13 = por %p820_p9, %p819_p6 }
  0x9e   : > { %p822_p12 = pnand %p821_p13, %p815_p11 }
  0xa0   : > { %825 = shalt.err (!%p822_p12)
}
  0xa1   : > { %s826_s18 = scalar_lea.hbm %s1242_s27, 256  ;;  %s830_s24 = scalar_lea.hbm %s1413_s1, 512 }
  0xa2   : > { %p827_p7 = scmp.ne.s32.totalorder %s1242_s27, %s826_s18  ;;  %p831_p0 = scmp.lt.u32.totalorder %s1242_s27, %s1413_s1 }
  0xa3   : > { %p832_p5 = scmp.lt.u32.totalorder %s830_s24, %s826_s18  ;;  %p834_p3 = scmp.lt.u32.totalorder %s826_s18, %s1242_s27 }
  0xa4   : > { %p828_p2 = pnand %p827_p7, %p1437_p1 }
  0xa5   : > { %p833_p8 = por %p832_p5, %p831_p0 }
  0xa6   : > { %p829_p4 = pneg %p828_p2 }
  0xa7   : > { %p835_p10 = por %p834_p3, %p833_p8 }
  0xa9   : > { %p836_p11 = pnand %p835_p10, %p829_p4 }
  0xab   : > { %839 = shalt.err (!%p836_p11)
}
  0xac   : > { %634 = dma.vmem_to_hbm [thread:$0]  (%p1437_p1), %s1278_s0, 256, %s1242_s27, %s317_s21, %s1005_s26, %s1005_s26, %s1006_s13  }
  0xad   : > { %s1438_s2 = sshll.u32 %s1201_s29, 4  ;;  %s1008_s28 = smov [#allocation8]   ;;  %s1310_s2 = int_to_ptr.vmem [resolvable:$true] %s1438_s2 }
  0xae   : > { %s840_s10 = scalar_lea.vmem %s1310_s2, 256  ;;  %s844_s18 = sshll.u32 %s1008_s28, 4  ;;  %s845_s18 = int_to_ptr.vmem [resolvable:$false] %s844_s18 }
  0xaf   : > { %p841_p6 = scmp.ne.s32.totalorder %s1310_s2, %s840_s10  ;;  %s846_s8 = scalar_lea.vmem %s845_s18, 512 }
  0xb0   : > { %p847_p12 = scmp.lt.s32.totalorder %s1310_s2, %s845_s18  ;;  %p848_p7 = scmp.lt.s32.totalorder %s846_s8, %s840_s10 }
  0xb1   : > { %p842_p9 = pnand %p841_p6, %p1437_p1 }
  0xb2   : > { %p849_p2 = por %p848_p7, %p847_p12 }
  0xb3   : > { %p843_p13 = pneg %p842_p9 }
  0xb5   : > { %p850_p4 = pnand %p849_p2, %p843_p13 }
  0xb7   : > { %853 = shalt.err (!%p850_p4)
}
  0xb8   : > { %s854_s29 = scalar_lea.hbm %s1276_s4, 256  ;;  %s858_s21 = scalar_lea.hbm %s1415_s3, 512 }
  0xb9   : > { %p855_p0 = scmp.ne.s32.totalorder %s1276_s4, %s854_s29  ;;  %p859_p3 = scmp.lt.u32.totalorder %s1276_s4, %s1415_s3 }
  0xba   : > { %p860_p10 = scmp.lt.u32.totalorder %s858_s21, %s854_s29  ;;  %p862_p6 = scmp.lt.u32.totalorder %s854_s29, %s1276_s4 }
  0xbb   : > { %p856_p5 = pnand %p855_p0, %p1437_p1 }
  0xbc   : > { %p861_p11 = por %p860_p10, %p859_p3 }
  0xbd   : > { %p857_p8 = pneg %p856_p5 }
  0xbe   : > { %p863_p9 = por %p862_p6, %p861_p11 }
  0xc0   : > { %p864_p13 = pnand %p863_p9, %p857_p8 }
  0xc2   : > { %867 = shalt.err (!%p864_p13)
}
  0xc3   : > { %636 = dma.vmem_to_hbm [thread:$0]  (%p1437_p1), %s1310_s2, 256, %s1276_s4, %s1244_s22, %s1005_s26, %s1005_s26, %s1006_s13  }
  0xc4   : > { %s1439_s28 = sld [smem:[#allocation21_spill]]  ;;  %s401_s8 = sshll.u32 %s1203_s5, 4  ;;  %s1344_s8 = int_to_ptr.vmem [resolvable:$true] %s401_s8 }
  0xc5   : > { %s332_s29 = scalar_lea.sflag [#allocation10], %s1194_s6  ;;  %s868_s27 = scalar_lea.vmem %s1344_s8, 256 }
  0xc6   : > { %p869_p12 = scmp.ne.s32.totalorder %s1344_s8, %s868_s27  ;;  %s1009_s0 = smov [#allocation9]  }
  0xc7   : > { %s872_s21 = sshll.u32 %s1009_s0, 4  ;;  %s873_s21 = int_to_ptr.vmem [resolvable:$false] %s872_s21 }
  0xc8   : > { %p870_p7 = pnand %p869_p12, %p1437_p1  ;;  %s874_s22 = scalar_lea.vmem %s873_s21, 512 }
  0xc9   : > { %p875_p4 = scmp.lt.s32.totalorder %s1344_s8, %s873_s21  ;;  %p876_p0 = scmp.lt.s32.totalorder %s874_s22, %s868_s27 }
  0xca   : > { %s1341_s18 = scalar_lea.hbm %s1439_s28, %s1227_s9  ;;  %p871_p2 = pneg %p870_p7 }
  0xcb   : > { %p877_p5 = por %p876_p0, %p875_p4 }
  0xcd   : > { %p878_p8 = pnand %p877_p5, %p871_p2 }
  0xcf   : > { %881 = shalt.err (!%p878_p8)
}
  0xd0   : > { %s882_s5 = scalar_lea.hbm %s1341_s18, 256  ;;  %s886_s2 = scalar_lea.hbm %s1439_s28, 512 }
  0xd1   : > { %p883_p3 = scmp.ne.s32.totalorder %s1341_s18, %s882_s5  ;;  %p887_p6 = scmp.lt.u32.totalorder %s1341_s18, %s1439_s28 }
  0xd2   : > { %p888_p9 = scmp.lt.u32.totalorder %s886_s2, %s882_s5  ;;  %p890_p12 = scmp.lt.u32.totalorder %s882_s5, %s1341_s18 }
  0xd3   : > { %p884_p10 = pnand %p883_p3, %p1437_p1 }
  0xd4   : > { %p889_p13 = por %p888_p9, %p887_p6 }
  0xd5   : > { %p885_p11 = pneg %p884_p10 }
  0xd6   : > { %p891_p7 = por %p890_p12, %p889_p13 }
  0xd8   : > { %p892_p2 = pnand %p891_p7, %p885_p11 }
  0xda   : > { %895 = shalt.err (!%p892_p2)
}
  0xdb   : > { %637 = dma.vmem_to_hbm [thread:$0]  (%p1437_p1), %s1344_s8, 256, %s1341_s18, %s332_s29, %s1005_s26, %s1005_s26, %s1006_s13  }
  0xdc PF: > { %p660_p4 = scmp.ge.s32.totalorder %s998_s25, 2  ;;  %s416_s7 = sand.u32 1, %s958_s15  }
  0xdd   : > { %p1440_p0 = scmp.ne.s32.totalorder %s1433_s14, 0  ;;  %s417_s10 = scalar_lea.sflag [#allocation4], %s416_s7 }
  0xdf   : > { %p647_p5 = pnand %p660_p4, %p1440_p0 }
  0xe1   : > { %945 = dma.done.wait (!%p647_p5), %s417_s10, 256  }
  0xe2   : > { %947 = vsyncadd (!%p647_p5), %s417_s10, 4294967040  ;;  %s1441_s11 = sadd.s32 4294967294, %s998_s25  }
  0xe3   : > { %s425_s27 = sand.u32 1, %s1441_s11  }
  0xe4   : > { %s426_s0 = scalar_lea.sflag [#allocation7], %s425_s27 }
  0xe5   : > { %949 = dma.done.wait (!%p647_p5), %s426_s0, 512  }
  0xe6   : > { %951 = vsyncadd (!%p647_p5), %s426_s0, 4294966784  ;;  %s444_s6 = scalar_lea.sflag [#allocation10], %s416_s7 }
  0xe7   : > { %953 = dma.done.wait (!%p647_p5), %s444_s6, 256  }
  0xe8   : > { %955 = vsyncadd (!%p647_p5), %s444_s6, 4294967040  ;;  %s27_s25 = sadd.s32 1, %s998_s25   ;;  %s1442_s14 = sld [smem:[#allocation18_spill]] }
  0xe9   : > { %p24_p1 = scmp.ge.s32.totalorder %s27_s25, 10   ;;  %s1443_s22 = sld [smem:[#allocation15_spill]] }
  0xea   : > { %s1444_s26 = sld [smem:[#allocation16_spill]]  ;;  %s1445_s24 = sld [smem:[#allocation17_spill]] }
  0xeb   : > { %s1446_s15 = smov %s962_s16  ;;  %s1447_s16 = smov %s966_s17 }
  0xec   : > { %s1448_s17 = smov %s1126_s12  ;;  %s1449_s18 = smov %s974_s19 }
  0xed   : > { %s1450_s19 = smov %s978_s20  ;;  %s1452_s21 = smov %s990_s23 }
  0xee   : > { %s1451_s20 = smov %s1442_s14  ;;  %26 = sbr.rel (!%p24_p1) target bundleno = 17 (0x11), region = 134 }
  0xf0   : > { %s1453_s23 = smov %s1444_s26 }
  0xf5   :  { %449 = vsyncpa [#allocation3], 1 }
  0xf6   :  { %451 = vsyncpa [#allocation3 + $0x1], 1 }
  0xf7   :  { %452 = vsyncpa [#allocation4], 1 }
  0xf8   :  { %454 = vsyncpa [#allocation4 + $0x1], 1 }
  0xf9   :  { %455 = vsyncpa [#allocation7], 1 }
  0xfa   :  { %457 = vsyncpa [#allocation7 + $0x1], 1 }
  0xfb   :  { %458 = vsyncpa [#allocation10], 1 }
  0xfc   :  { %460 = vsyncpa [#allocation10 + $0x1], 1 }

</bundles_post_ra>
